<compile_context>
chip_gen: v7x
topology: tpu7x:2x2x1
jax: 0.10.0
libtpu: 0.0.40
codegen_flags: <defaults>
</compile_context>

<pallas_src>
import functools

import jax
import jax.numpy as jnp
from jax.experimental import pallas as pl
from jax.experimental.pallas import tpu as pltpu


def _round_up(x, m):
    return (x + m - 1) // m * m


# ----------------------------------------------------------------------------
# Pallas kernel: one M-tile of the im2col matmul, bias + optional SiLU fused
# ----------------------------------------------------------------------------
def _conv_mm_kernel(p_ref, w_ref, b_ref, o_ref, *, apply_silu):
    # (tm, 9*Cin) @ (9*Cin, Cout_pad) on the MXU, fp32 accumulation.
    y = jnp.dot(p_ref[...], w_ref[...], preferred_element_type=jnp.float32)
    y = y + b_ref[...]
    if apply_silu:
        # SiLU epilogue: exp runs on the EUP; exact divide keeps fp32 numerics.
        y = y * (1.0 / (1.0 + jnp.exp(-y)))
    o_ref[...] = y.astype(o_ref.dtype)


# ----------------------------------------------------------------------------
# Wrapper: 3x3 conv, padding=1, stride s, optional fused SiLU
# ----------------------------------------------------------------------------
def conv3x3_pallas(x, w, b, *, stride=1, apply_silu=False, tm=512):
    """x: (N, H, W, Cin) NHWC; w: (3, 3, Cin, Cout); b: (Cout,)."""
    N, H, W, Cin = x.shape
    Cout = w.shape[-1]
    Ho = (H + 2 - 3) // stride + 1
    Wo = (W + 2 - 3) // stride + 1
    M = N * Ho * Wo
    K = 9 * Cin

    # Glue (XLA side): one contiguous lane-packed im2col buffer (M, 9*Cin).
    xp = jnp.pad(x, ((0, 0), (1, 1), (1, 1), (0, 0)))
    taps = []
    for ky in range(3):
        for kx in range(3):
            taps.append(
                xp[
                    :,
                    ky : ky + stride * (Ho - 1) + 1 : stride,
                    kx : kx + stride * (Wo - 1) + 1 : stride,
                    :,
                ]
            )
    p = jnp.concatenate(taps, axis=-1).reshape(M, K)
    # TODO(synk): cast p / wm to bfloat16 on v6e/v7x (keep fp32 accumulation)
    # to halve HBM/VMEM traffic on the mem-bound early layers.

    # Lane-dense output: pad Cout to a multiple of 128; sliced back below.
    Cp = _round_up(Cout, 128)
    wm = jnp.pad(w.reshape(K, Cout), ((0, 0), (0, Cp - Cout)))
    bm = jnp.pad(b.reshape(1, Cout), ((0, 0), (0, Cp - Cout)))

    # Tile M (sublane-aligned); pad rows so the grid divides evenly.
    # tm=512 keeps double-buffered patches + output + resident weights well
    # under the 32 MiB scoped VMEM default even at K=864, Cp=256 (~5 MiB),
    # so it fits v5e/v6e (128 MiB) and v7x (64 MiB physical).
    tm_eff = min(tm, _round_up(M, 8))
    Mp = _round_up(M, tm_eff)
    if Mp != M:
        p = jnp.pad(p, ((0, Mp - M), (0, 0)))

    kernel = functools.partial(_conv_mm_kernel, apply_silu=apply_silu)

    out = pl.pallas_call(
        kernel,
        out_shape=jax.ShapeDtypeStruct((Mp, Cp), x.dtype),
        grid_spec=pltpu.PrefetchScalarGridSpec(
            num_scalar_prefetch=0,
            grid=(Mp // tm_eff,),
            in_specs=[
                pl.BlockSpec((tm_eff, K), lambda i: (i, 0)),  # streamed patches
                pl.BlockSpec((K, Cp), lambda i: (0, 0)),      # resident weights
                pl.BlockSpec((1, Cp), lambda i: (0, 0)),      # resident bias
            ],
            out_specs=pl.BlockSpec((tm_eff, Cp), lambda i: (i, 0)),
        ),
        compiler_params=pltpu.CompilerParams(
            # Independent M tiles: shard across v7x's two TensorCores.
            dimension_semantics=("parallel",),
        ),
    )(p, wm, bm)

    return out[:M, :Cout].reshape(N, Ho, Wo, Cout)


# ----------------------------------------------------------------------------
# Parameter construction (deterministic, synthetic init)
# ----------------------------------------------------------------------------
def init_params(key, in_channels, out_channels, num_channels=(16, 32, 96, 256)):
    def conv_init(k, cin, cout, scale=0.1):
        kw, kb = jax.random.split(k)
        w = scale * jax.random.normal(kw, (3, 3, cin, cout), jnp.float32)
        b = 0.01 * jax.random.normal(kb, (cout,), jnp.float32)
        return w, b

    keys = jax.random.split(key, 2 + 2 * (len(num_channels) - 2))
    ki = 0

    params = {}
    params["conv_in"] = conv_init(keys[ki], in_channels, num_channels[0]); ki += 1

    blocks = []
    for i in range(len(num_channels) - 2):
        cin, cout = num_channels[i], num_channels[i + 1]
        w, b = conv_init(keys[ki], cin, cin); ki += 1
        blocks.append((w, b, 1))                       # stride-1 conv
        w, b = conv_init(keys[ki], cin, cout); ki += 1
        blocks.append((w, b, 2))                       # stride-2 downsample conv
    params["blocks"] = blocks

    # zero_module(conv_out): weights and bias are zeros
    params["conv_out"] = (
        jnp.zeros((3, 3, num_channels[-2], out_channels), jnp.float32),
        jnp.zeros((out_channels,), jnp.float32),
    )
    return params


# ----------------------------------------------------------------------------
# Forward pass (matches ControlNetConditioningEmbedding.forward)
# ----------------------------------------------------------------------------
def controlnet_conditioning_embedding(x_nchw, params):
    # NCHW (PyTorch) -> NHWC (kernel layout)
    h = jnp.transpose(x_nchw, (0, 2, 3, 1))

    w, b = params["conv_in"]
    h = conv3x3_pallas(h, w, b, stride=1, apply_silu=True)

    for (w, b, s) in params["blocks"]:
        h = conv3x3_pallas(h, w, b, stride=s, apply_silu=True)

    w, b = params["conv_out"]
    h = conv3x3_pallas(h, w, b, stride=1, apply_silu=False)

    # NHWC -> NCHW to match PyTorch output layout
    return jnp.transpose(h, (0, 3, 1, 2))


# ----------------------------------------------------------------------------
# Pure-JAX reference for correctness (lax conv, NHWC/HWIO)
# ----------------------------------------------------------------------------
def _conv3x3_ref(x, w, b, stride, apply_silu):
    y = jax.lax.conv_general_dilated(
        x, w,
        window_strides=(stride, stride),
        padding=((1, 1), (1, 1)),
        dimension_numbers=("NHWC", "HWIO", "NHWC"),
    ) + b
    if apply_silu:
        y = y * jax.nn.sigmoid(y)
    return y


def _forward_ref(x_nchw, params):
    h = jnp.transpose(x_nchw, (0, 2, 3, 1))
    w, b = params["conv_in"]
    h = _conv3x3_ref(h, w, b, 1, True)
    for (w, b, s) in params["blocks"]:
        h = _conv3x3_ref(h, w, b, s, True)
    w, b = params["conv_out"]
    h = _conv3x3_ref(h, w, b, 1, False)
    return jnp.transpose(h, (0, 3, 1, 2))


if __name__ == "__main__":
    key = jax.random.PRNGKey(0)
    k_x, k_p = jax.random.split(key)

    batch, in_channels, out_channels, spatial = 2, 4, 8, 16
    x = jax.random.normal(k_x, (batch, in_channels, spatial, spatial), jnp.float32)

    params = init_params(k_p, in_channels, out_channels)

    out = controlnet_conditioning_embedding(x, params)
    out = jax.block_until_ready(out)

    # sanity: shape (N, out_channels, H/4, W/4) and numerics vs lax reference
    assert out.shape == (batch, out_channels, spatial // 4, spatial // 4), out.shape
    ref = jax.block_until_ready(_forward_ref(x, params))
    assert jnp.allclose(out, ref, atol=1e-4, rtol=1e-4)

    print("KERNEL_OK")
</pallas_src>

<mosaic_0001>
module attributes {stable_mosaic.version = 11 : i64} {
  func.func @_conv_mm_kernel(%arg0: i32, %arg1: memref<512x36xf32, #tpu.memory_space<vmem>>, %arg2: memref<36x128xf32, #tpu.memory_space<vmem>>, %arg3: memref<1x128xf32, #tpu.memory_space<vmem>>, %arg4: memref<512x128xf32, #tpu.memory_space<vmem>>) attributes {dimension_semantics = [#tpu.dimension_semantics<parallel>], iteration_bounds = array<i64: 1>, scalar_prefetch = 0 : i64, scratch_operands = 0 : i64, tpu.core_type = #tpu.core_type<tc>, window_params = [{transform_indices = @transform_0, window_bounds = array<i64: 512, 36>}, {pipeline_mode = #tpu.pipeline_mode<synchronous>, transform_indices = @transform_1, window_bounds = array<i64: 36, 128>}, {pipeline_mode = #tpu.pipeline_mode<synchronous>, transform_indices = @transform_2, window_bounds = array<i64: 1, 128>}, {transform_indices = @transform_3, window_bounds = array<i64: 512, 128>}]} {
    %c0 = arith.constant 0 : index
    %c0_0 = arith.constant 0 : index
    %0 = vector.load %arg1[%c0, %c0_0] : memref<512x36xf32, #tpu.memory_space<vmem>>, vector<512x36xf32>
    %c0_1 = arith.constant 0 : index
    %c0_2 = arith.constant 0 : index
    %1 = vector.load %arg2[%c0_1, %c0_2] : memref<36x128xf32, #tpu.memory_space<vmem>>, vector<36x128xf32>
    %cst = arith.constant dense<0.000000e+00> : vector<512x128xf32>
    %2 = tpu.matmul %0, %1, %cst {dimension_numbers = #tpu.dot_dimension_numbers<[1], [0], [0], [1], [0, 0, 1, 1], [], []>} : vector<512x36xf32>, vector<36x128xf32>, vector<512x128xf32> -> vector<512x128xf32>
    %c0_3 = arith.constant 0 : index
    %c0_4 = arith.constant 0 : index
    %3 = vector.load %arg3[%c0_3, %c0_4] : memref<1x128xf32, #tpu.memory_space<vmem>>, vector<1x128xf32>
    %4 = vector.broadcast %3 : vector<1x128xf32> to vector<512x128xf32>
    %5 = arith.addf %2, %4 : vector<512x128xf32>
    %cst_5 = arith.constant 0.000000e+00 : f32
    %6 = vector.broadcast %cst_5 : f32 to vector<512x128xf32>
    %7 = arith.subf %6, %5 : vector<512x128xf32>
    %8 = math.exp %7 : vector<512x128xf32>
    %cst_6 = arith.constant 1.000000e+00 : f32
    %9 = vector.broadcast %cst_6 : f32 to vector<512x128xf32>
    %10 = arith.addf %9, %8 : vector<512x128xf32>
    %cst_7 = arith.constant 1.000000e+00 : f32
    %11 = vector.broadcast %cst_7 : f32 to vector<512x128xf32>
    %12 = arith.divf %11, %10 : vector<512x128xf32>
    %13 = arith.mulf %5, %12 : vector<512x128xf32>
    %c0_8 = arith.constant 0 : index
    %c0_9 = arith.constant 0 : index
    %14 = vector.load %arg4[%c0_8, %c0_9] : memref<512x128xf32, #tpu.memory_space<vmem>>, vector<512x128xf32>
    tpu.vector_store %arg4[%c0_8, %c0_9], %13 {strides = array<i32>} : memref<512x128xf32, #tpu.memory_space<vmem>>, vector<512x128xf32>,
    return
  }
  func.func @transform_0(%arg0: i32) -> (i32, i32) {
    %c0_i32 = arith.constant 0 : i32
    %c0_i32_0 = arith.constant 0 : i32
    return %arg0, %c0_i32 : i32, i32
  }
  func.func @transform_1(%arg0: i32) -> (i32, i32) {
    %c0_i32 = arith.constant 0 : i32
    %c0_i32_0 = arith.constant 0 : i32
    %c0_i32_1 = arith.constant 0 : i32
    return %c0_i32, %c0_i32_0 : i32, i32
  }
  func.func @transform_2(%arg0: i32) -> (i32, i32) {
    %c0_i32 = arith.constant 0 : i32
    %c0_i32_0 = arith.constant 0 : i32
    %c0_i32_1 = arith.constant 0 : i32
    return %c0_i32, %c0_i32_0 : i32, i32
  }
  func.func @transform_3(%arg0: i32) -> (i32, i32) {
    %c0_i32 = arith.constant 0 : i32
    %c0_i32_0 = arith.constant 0 : i32
    return %arg0, %c0_i32 : i32, i32
  }
}

</mosaic_0001>

<bundles_post_ra>
// kernel: tpu_custom_call.1
= control target key start
LH: loop header
LB: loop body
LE: loop exit
PB: predicated region body
PF: predicated region fallthrough
CT: control target
= control target key end

     0   :  { %vm91_vm0 = vcmask 293888   ;;  %vm284_vm1 = vcmask 1043456   ;;  %s2482_s0 = inlined_call_operand.vmem [shape: f32[512,36], index: 0, kind: input, shape index: {}]   ;;  %s2483_s1 = inlined_call_operand.vmem [shape: f32[36,128], index: 1, kind: input, shape index: {}]   ;;  %s2484_s2 = inlined_call_operand.vmem [shape: f32[1,128], index: 2, kind: input, shape index: {}]   ;;  %s2485_s3 = inlined_call_operand.hbm [shape: f32[512,128], index: 3, kind: output, shape index: {}]  }
   0x1   :  { %v79_v0 = vld [vmem:[%s2483_s1] sm:$0xff]  ;;  %v80_v1 = vld [vmem:[%s2483_s1 + $0x8] sm:$0xff]  ;;  %v81_v2 = vld [vmem:[%s2483_s1 + $0x10] sm:$0xff] }
   0x2   :  { %v1442_v3 = vpack.c.bf16 %v80_v1, %v79_v0  ;;  %v82_v4 = vld [vmem:[%s2483_s1 + $0x18] sm:$0xff]  ;;  %v15_v5 = vld [vmem:[%s2482_s0] sm:$0xff]  ;;  %v16_v9 = vld [vmem:[%s2482_s0 + $0x8] sm:$0xff] }
   0x3   :  { %v1446_v6 = vpack.c.bf16 %v82_v4, %v81_v2  ;;  %1346 = vmatprep.mubr.msk.f32.mxu0 %vm91_vm0, %v15_v5  ;;  %v47_v7 = vld [vmem:[%s2482_s0 + $0x100] sm:$0xff]  ;;  %v48_v10 = vld [vmem:[%s2482_s0 + $0x108] sm:$0xff]  ;;  %v17_v11 = vld [vmem:[%s2482_s0 + $0x10] sm:$0xff] }
   0x4   :  { %1443 = vmatprep.subr.bf16.mxu0 %v1442_v3  ;;  %1450 = vmatprep.subr.bf16.mxu1 %v1442_v3  ;;  %v83_v8 = vld [vmem:[%s2483_s1 + $0x20] sm:$0xf]  ;;  %v49_v12 = vld [vmem:[%s2482_s0 + $0x110] sm:$0xff]  ;;  %v18_v13 = vld [vmem:[%s2482_s0 + $0x18] sm:$0xff] }
   0x5   :  { %1445 = vmatpush3.bf16.msra.mxu0 %v1442_v3  ;;  %1453 = vmatpush3.bf16.msra.mxu1 %v1442_v3  ;;  %v50_v14 = vld [vmem:[%s2482_s0 + $0x118] sm:$0xff]  ;;  %v19_v15 = vld [vmem:[%s2482_s0 + $0x20] sm:$0xff]  ;;  %v20_v17 = vld [vmem:[%s2482_s0 + $0x28] sm:$0xff] }
   0x6   :  { %1447 = vmatprep.subr.bf16.mxu0 %v1446_v6  ;;  %1451 = vmatprep.subr.bf16.mxu1 %v1446_v6  ;;  %v51_v16 = vld [vmem:[%s2482_s0 + $0x120] sm:$0xff]  ;;  %v52_v18 = vld [vmem:[%s2482_s0 + $0x128] sm:$0xff]  ;;  %v21_v19 = vld [vmem:[%s2482_s0 + $0x30] sm:$0xff] }
   0x7   :  { %1394 = vmatprep.mubr.msk.f32.mxu1 %vm91_vm0, %v47_v7  ;;  %v53_v20 = vld [vmem:[%s2482_s0 + $0x130] sm:$0xff]  ;;  %v22_v21 = vld [vmem:[%s2482_s0 + $0x38] sm:$0xff]  ;;  %v23_v23 = vld [vmem:[%s2482_s0 + $0x40] sm:$0xff] }
   0x8   :  { %v54_v22 = vld [vmem:[%s2482_s0 + $0x138] sm:$0xff]  ;;  %v55_v24 = vld [vmem:[%s2482_s0 + $0x140] sm:$0xff] }
   0x9   :  { %1449 = vmatpush3.bf16.msra.mxu0 %v1446_v6  ;;  %1454 = vmatpush3.bf16.msra.mxu1 %v1446_v6 }
   0xa   :  { %1344 = vmatprep.subr.msk.mxu0 %vm284_vm1, %v83_v8  ;;  %1452 = vmatprep.subr.msk.mxu1 %vm284_vm1, %v83_v8 }
   0xd   :  { %1345 = vmatpush3.msk.msra.mxu0 %vm284_vm1, %v83_v8  ;;  %1455 = vmatpush3.msk.msra.mxu1 %vm284_vm1, %v83_v8 }
   0xe   :  { %1347 = vmatmul.mubr.msk.f32.vlgmr.msra.gmra.mrb[0].mxu0 %vm91_vm0, %v16_v9  ;;  %1395 = vmatmul.mubr.msk.f32.vlgmr.msra.gmra.mrb[0].mxu1 %vm91_vm0, %v48_v10 }
   0xf   :  { %1349 = vmatprep.mubr.msk.f32.mxu0 %vm91_vm0, %v17_v11  ;;  %1397 = vmatprep.mubr.msk.f32.mxu1 %vm91_vm0, %v49_v12 }
  0x12   :  { %1350 = vmatmul.mubr.msk.f32.gmra.mrb[2].mxu0 %vm91_vm0, %v18_v13  ;;  %1398 = vmatmul.mubr.msk.f32.gmra.mrb[2].mxu1 %vm91_vm0, %v50_v14 }
  0x13   :  { %1352 = vmatprep.mubr.msk.f32.mxu0 %vm91_vm0, %v19_v15  ;;  %1400 = vmatprep.mubr.msk.f32.mxu1 %vm91_vm0, %v51_v16 }
  0x16   :  { %1353 = vmatmul.mubr.msk.f32.gmra.mrb[4].mxu0 %vm91_vm0, %v20_v17  ;;  %1401 = vmatmul.mubr.msk.f32.gmra.mrb[4].mxu1 %vm91_vm0, %v52_v18 }
  0x17   :  { %1355 = vmatprep.mubr.msk.f32.mxu0 %vm91_vm0, %v21_v19  ;;  %1403 = vmatprep.mubr.msk.f32.mxu1 %vm91_vm0, %v53_v20 }
  0x18   :  { %8 = vsyncpa [#allocation3], 0  ;;  %v24_v25 = vld [vmem:[%s2482_s0 + $0x48] sm:$0xff]  ;;  %v25_v27 = vld [vmem:[%s2482_s0 + $0x50] sm:$0xff] }
  0x19   :  { %v56_v26 = vld [vmem:[%s2482_s0 + $0x148] sm:$0xff]  ;;  %v57_v28 = vld [vmem:[%s2482_s0 + $0x150] sm:$0xff]  ;;  %v26_v29 = vld [vmem:[%s2482_s0 + $0x58] sm:$0xff] }
  0x1a   :  { %1356 = vmatmul.mubr.msk.f32.gmra.mrb[6].mxu0 %vm91_vm0, %v22_v21  ;;  %1404 = vmatmul.mubr.msk.f32.gmra.mrb[6].mxu1 %vm91_vm0, %v54_v22  ;;  %v58_v30 = vld [vmem:[%s2482_s0 + $0x158] sm:$0xff]  ;;  %v27_v31 = vld [vmem:[%s2482_s0 + $0x60] sm:$0xff]  ;;  %v28_v33 = vld [vmem:[%s2482_s0 + $0x68] sm:$0xff] }
  0x1b   :  { %1358 = vmatprep.mubr.msk.f32.mxu0 %vm91_vm0, %v23_v23  ;;  %1406 = vmatprep.mubr.msk.f32.mxu1 %vm91_vm0, %v55_v24  ;;  %v59_v32 = vld [vmem:[%s2482_s0 + $0x160] sm:$0xff]  ;;  %v60_v34 = vld [vmem:[%s2482_s0 + $0x168] sm:$0xff]  ;;  %v29_v35 = vld [vmem:[%s2482_s0 + $0x70] sm:$0xff] }
  0x1c   :  { %v61_v36 = vld [vmem:[%s2482_s0 + $0x170] sm:$0xff]  ;;  %v30_v37 = vld [vmem:[%s2482_s0 + $0x78] sm:$0xff]  ;;  %v31_v39 = vld [vmem:[%s2482_s0 + $0x80] sm:$0xff] }
  0x1d   :  { %v62_v38 = vld [vmem:[%s2482_s0 + $0x178] sm:$0xff]  ;;  %v63_v40 = vld [vmem:[%s2482_s0 + $0x180] sm:$0xff]  ;;  %v32_v41 = vld [vmem:[%s2482_s0 + $0x88] sm:$0xff] }
  0x1e   :  { %1359 = vmatmul.mubr.msk.f32.gmra.mrb[8].mxu0 %vm91_vm0, %v24_v25  ;;  %1407 = vmatmul.mubr.msk.f32.gmra.mrb[8].mxu1 %vm91_vm0, %v56_v26  ;;  %v64_v42 = vld [vmem:[%s2482_s0 + $0x188] sm:$0xff]  ;;  %v33_v43 = vld [vmem:[%s2482_s0 + $0x90] sm:$0xff]  ;;  %v34_v45 = vld [vmem:[%s2482_s0 + $0x98] sm:$0xff] }
  0x1f   :  { %1361 = vmatprep.mubr.msk.f32.mxu0 %vm91_vm0, %v25_v27  ;;  %1409 = vmatprep.mubr.msk.f32.mxu1 %vm91_vm0, %v57_v28  ;;  %v65_v44 = vld [vmem:[%s2482_s0 + $0x190] sm:$0xff]  ;;  %v66_v46 = vld [vmem:[%s2482_s0 + $0x198] sm:$0xff]  ;;  %v35_v47 = vld [vmem:[%s2482_s0 + $0xa0] sm:$0xff] }
  0x20   :  { %v67_v48 = vld [vmem:[%s2482_s0 + $0x1a0] sm:$0xff]  ;;  %v36_v49 = vld [vmem:[%s2482_s0 + $0xa8] sm:$0xff]  ;;  %v37_v51 = vld [vmem:[%s2482_s0 + $0xb0] sm:$0xff] }
  0x21   :  { %v68_v50 = vld [vmem:[%s2482_s0 + $0x1a8] sm:$0xff]  ;;  %v69_v52 = vld [vmem:[%s2482_s0 + $0x1b0] sm:$0xff]  ;;  %v38_v53 = vld [vmem:[%s2482_s0 + $0xb8] sm:$0xff] }
  0x22   :  { %1362 = vmatmul.mubr.msk.f32.gmra.mrb[10].mxu0 %vm91_vm0, %v26_v29  ;;  %1410 = vmatmul.mubr.msk.f32.gmra.mrb[10].mxu1 %vm91_vm0, %v58_v30  ;;  %v70_v54 = vld [vmem:[%s2482_s0 + $0x1b8] sm:$0xff]  ;;  %v39_v55 = vld [vmem:[%s2482_s0 + $0xc0] sm:$0xff]  ;;  %v40_v57 = vld [vmem:[%s2482_s0 + $0xc8] sm:$0xff] }
  0x23   :  { %1364 = vmatprep.mubr.msk.f32.mxu0 %vm91_vm0, %v27_v31  ;;  %1412 = vmatprep.mubr.msk.f32.mxu1 %vm91_vm0, %v59_v32  ;;  %v71_v56 = vld [vmem:[%s2482_s0 + $0x1c0] sm:$0xff]  ;;  %v72_v58 = vld [vmem:[%s2482_s0 + $0x1c8] sm:$0xff]  ;;  %v41_v59 = vld [vmem:[%s2482_s0 + $0xd0] sm:$0xff] }
  0x24   :  { %v73_v60 = vld [vmem:[%s2482_s0 + $0x1d0] sm:$0xff]  ;;  %v42_v61 = vld [vmem:[%s2482_s0 + $0xd8] sm:$0xff]  ;;  %v43_v63 = vld [vmem:[%s2482_s0 + $0xe0] sm:$0xff] }
  0x25   :  { %v74_v62 = vld [vmem:[%s2482_s0 + $0x1d8] sm:$0xff]  ;;  %v75_v0 = vld [vmem:[%s2482_s0 + $0x1e0] sm:$0xff]  ;;  %v44_v1 = vld [vmem:[%s2482_s0 + $0xe8] sm:$0xff] }
  0x26   :  { %1365 = vmatmul.mubr.msk.f32.gmra.mrb[12].mxu0 %vm91_vm0, %v28_v33  ;;  %1413 = vmatmul.mubr.msk.f32.gmra.mrb[12].mxu1 %vm91_vm0, %v60_v34  ;;  %v76_v2 = vld [vmem:[%s2482_s0 + $0x1e8] sm:$0xff]  ;;  %v45_v3 = vld [vmem:[%s2482_s0 + $0xf0] sm:$0xff]  ;;  %v46_v5 = vld [vmem:[%s2482_s0 + $0xf8] sm:$0xff] }
  0x27   :  { %1367 = vmatprep.mubr.msk.f32.mxu0 %vm91_vm0, %v29_v35  ;;  %1415 = vmatprep.mubr.msk.f32.mxu1 %vm91_vm0, %v61_v36  ;;  %v77_v4 = vld [vmem:[%s2482_s0 + $0x1f0] sm:$0xff]  ;;  %v78_v6 = vld [vmem:[%s2482_s0 + $0x1f8] sm:$0xff]  ;;  %v2037_v7 = vld [vmem:[%s2484_s2] ss:$0 sm:$0xff] }
  0x2a   :  { %1368 = vmatmul.mubr.msk.f32.gmra.mrb[14].mxu0 %vm91_vm0, %v30_v37  ;;  %1416 = vmatmul.mubr.msk.f32.gmra.mrb[14].mxu1 %vm91_vm0, %v62_v38 }
  0x2b   :  { %1370 = vmatprep.mubr.msk.f32.mxu0 %vm91_vm0, %v31_v39  ;;  %1418 = vmatprep.mubr.msk.f32.mxu1 %vm91_vm0, %v63_v40 }
  0x2e   :  { %1371 = vmatmul.mubr.msk.f32.gmra.mrb[16].mxu0 %vm91_vm0, %v32_v41  ;;  %1419 = vmatmul.mubr.msk.f32.gmra.mrb[16].mxu1 %vm91_vm0, %v64_v42 }
  0x2f   :  { %1373 = vmatprep.mubr.msk.f32.mxu0 %vm91_vm0, %v33_v43  ;;  %1421 = vmatprep.mubr.msk.f32.mxu1 %vm91_vm0, %v65_v44 }
  0x32   :  { %1374 = vmatmul.mubr.msk.f32.gmra.mrb[18].mxu0 %vm91_vm0, %v34_v45  ;;  %1422 = vmatmul.mubr.msk.f32.gmra.mrb[18].mxu1 %vm91_vm0, %v66_v46 }
  0x33   :  { %1376 = vmatprep.mubr.msk.f32.mxu0 %vm91_vm0, %v35_v47  ;;  %1424 = vmatprep.mubr.msk.f32.mxu1 %vm91_vm0, %v67_v48 }
  0x36   :  { %1377 = vmatmul.mubr.msk.f32.gmra.mrb[20].mxu0 %vm91_vm0, %v36_v49  ;;  %1425 = vmatmul.mubr.msk.f32.gmra.mrb[20].mxu1 %vm91_vm0, %v68_v50 }
  0x37   :  { %1379 = vmatprep.mubr.msk.f32.mxu0 %vm91_vm0, %v37_v51  ;;  %1427 = vmatprep.mubr.msk.f32.mxu1 %vm91_vm0, %v69_v52 }
  0x3a   :  { %1380 = vmatmul.mubr.msk.f32.gmra.mrb[22].mxu0 %vm91_vm0, %v38_v53  ;;  %1428 = vmatmul.mubr.msk.f32.gmra.mrb[22].mxu1 %vm91_vm0, %v70_v54 }
  0x3b   :  { %1382 = vmatprep.mubr.msk.f32.mxu0 %vm91_vm0, %v39_v55  ;;  %1430 = vmatprep.mubr.msk.f32.mxu1 %vm91_vm0, %v71_v56 }
  0x3e   :  { %1383 = vmatmul.mubr.msk.f32.gmra.mrb[24].mxu0 %vm91_vm0, %v40_v57  ;;  %1431 = vmatmul.mubr.msk.f32.gmra.mrb[24].mxu1 %vm91_vm0, %v72_v58 }
  0x3f   :  { %1385 = vmatprep.mubr.msk.f32.mxu0 %vm91_vm0, %v41_v59  ;;  %1433 = vmatprep.mubr.msk.f32.mxu1 %vm91_vm0, %v73_v60 }
  0x42   :  { %1386 = vmatmul.mubr.msk.f32.gmra.mrb[26].mxu0 %vm91_vm0, %v42_v61  ;;  %1434 = vmatmul.mubr.msk.f32.gmra.mrb[26].mxu1 %vm91_vm0, %v74_v62 }
  0x43   :  { %1388 = vmatprep.mubr.msk.f32.mxu0 %vm91_vm0, %v43_v63  ;;  %1436 = vmatprep.mubr.msk.f32.mxu1 %vm91_vm0, %v75_v0 }
  0x46   :  { %1389 = vmatmul.mubr.msk.f32.gmra.mrb[28].mxu0 %vm91_vm0, %v44_v1  ;;  %1437 = vmatmul.mubr.msk.f32.gmra.mrb[28].mxu1 %vm91_vm0, %v76_v2 }
  0x47   :  { %1391 = vmatprep.mubr.msk.f32.mxu0 %vm91_vm0, %v45_v3  ;;  %1439 = vmatprep.mubr.msk.f32.mxu1 %vm91_vm0, %v77_v4 }
  0x4a   :  { %1392 = vmatmul.mubr.msk.f32.gmra.mrb[30].mxu0 %vm91_vm0, %v46_v5  ;;  %1440 = vmatmul.mubr.msk.f32.gmra.mrb[30].mxu1 %vm91_vm0, %v78_v6 }
  0xe1   :  { %v1348_v8 = vpop.f32.mrb[0].mxu0  ;;  %v1396_v9 = vpop.f32.mrb[0].mxu1 }
  0xe2   :  { %v2040_v10 = vadd.f32 %v1348_v8, %v2037_v7  ;;  %v2043_v11 = vadd.f32 %v1396_v9, %v2037_v7  ;;  %v354_v12 = vpop.f32.mrb[1].mxu0  ;;  %v514_v13 = vpop.f32.mrb[1].mxu1 }
  0xe3   :  { %v2046_v14 = vadd.f32 %v2037_v7, %v354_v12  ;;  %v2049_v15 = vadd.f32 %v2037_v7, %v514_v13 }
  0xe4   :  { %v674_v16 = vsub.f32 0.0, %v2040_v10  ;;  %v706_v17 = vsub.f32 0.0, %v2043_v11 }
  0xe5   :  { %v673_v18 = vsub.f32 0.0, %v2046_v14  ;;  %v705_v19 = vsub.f32 0.0, %v2049_v15  ;;  %v1351_v20 = vpop.f32.mrb[2].mxu0  ;;  %v1399_v21 = vpop.f32.mrb[2].mxu1 }
  0xe6   :  { %v739_v22 = vmul.f32 1.442695, %v674_v16  ;;  %v803_v23 = vmul.f32 1.442695, %v706_v17  ;;  %v2056_v24 = vadd.f32 %v1351_v20, %v2037_v7  ;;  %v2059_v25 = vadd.f32 %v1399_v21, %v2037_v7  ;;  %v364_v26 = vpop.f32.mrb[3].mxu0  ;;  %v524_v27 = vpop.f32.mrb[3].mxu1 }
  0xe7   :  { %v737_v28 = vmul.f32 1.442695, %v673_v18  ;;  %v801_v29 = vmul.f32 1.442695, %v705_v19  ;;  %v2062_v30 = vadd.f32 %v2037_v7, %v364_v26  ;;  %v2065_v31 = vadd.f32 %v2037_v7, %v524_v27 }
  0xe8   :  { %1459 = vpow2.f32 %v739_v22  ;;  %v676_v32 = vsub.f32 0.0, %v2056_v24  ;;  %v708_v33 = vsub.f32 0.0, %v2059_v25 }
  0xe9   :  { %1461 = vpow2.f32 %v803_v23  ;;  %v675_v34 = vsub.f32 0.0, %v2062_v30  ;;  %v707_v35 = vsub.f32 0.0, %v2065_v31  ;;  %v1354_v36 = vpop.f32.mrb[4].mxu0  ;;  %v1402_v37 = vpop.f32.mrb[4].mxu1 }
  0xea   :  { %1463 = vpow2.f32 %v737_v28  ;;  %v743_v38 = vmul.f32 1.442695, %v676_v32  ;;  %v807_v39 = vmul.f32 1.442695, %v708_v33  ;;  %v2072_v40 = vadd.f32 %v1354_v36, %v2037_v7  ;;  %v374_v41 = vpop.f32.mrb[5].mxu0  ;;  %v534_v42 = vpop.f32.mrb[5].mxu1 }
  0xeb   :  { %1465 = vpow2.f32 %v801_v29  ;;  %v741_v43 = vmul.f32 1.442695, %v675_v34  ;;  %v805_v44 = vmul.f32 1.442695, %v707_v35  ;;  %v2075_v45 = vadd.f32 %v1402_v37, %v2037_v7 }
  0xec   :  { %1467 = vpow2.f32 %v743_v38  ;;  %v678_v46 = vsub.f32 0.0, %v2072_v40  ;;  %v2079_v47 = vadd.f32 %v2037_v7, %v374_v41  ;;  %v2082_v48 = vadd.f32 %v2037_v7, %v534_v42 }
  0xed   :  { %1469 = vpow2.f32 %v807_v39  ;;  %v710_v49 = vsub.f32 0.0, %v2075_v45  ;;  %v1357_v50 = vpop.f32.mrb[6].mxu0  ;;  %v1405_v51 = vpop.f32.mrb[6].mxu1 }
  0xee   :  { %1471 = vpow2.f32 %v741_v43  ;;  %v747_v52 = vmul.f32 1.442695, %v678_v46  ;;  %v677_v53 = vsub.f32 0.0, %v2079_v47  ;;  %v709_v54 = vsub.f32 0.0, %v2082_v48  ;;  %v384_v55 = vpop.f32.mrb[7].mxu0  ;;  %v544_v56 = vpop.f32.mrb[7].mxu1 }
  0xef   :  { %1473 = vpow2.f32 %v805_v44  ;;  %v811_v57 = vmul.f32 1.442695, %v710_v49  ;;  %v2088_v60 = vadd.f32 %v1357_v50, %v2037_v7  ;;  %v2091_v0 = vadd.f32 %v1405_v51, %v2037_v7 }
  0xf0   :  { %1475 = vpow2.f32 %v747_v52  ;;  %v745_v58 = vmul.f32 1.442695, %v677_v53  ;;  %v809_v59 = vmul.f32 1.442695, %v709_v54  ;;  %v2094_v8 = vadd.f32 %v2037_v7, %v384_v55 }
  0xf1   :  { %1477 = vpow2.f32 %v811_v57  ;;  %v1360_v61 = vpop.f32.mrb[8].mxu0  ;;  %v1408_v62 = vpop.f32.mrb[8].mxu1  ;;  %v680_v13 = vsub.f32 0.0, %v2088_v60  ;;  %v712_v20 = vsub.f32 0.0, %v2091_v0  ;;  %v2099_v21 = vadd.f32 %v2037_v7, %v544_v56 }
  0xf2   :  { %v1460_v63 = vpop.eup %1459  ;;  %1479 = vpow2.f32 %v745_v58  ;;  %v394_v1 = vpop.f32.mrb[9].mxu0  ;;  %v2102_v27 = vadd.f32 %v1360_v61, %v2037_v7  ;;  %v679_v33 = vsub.f32 0.0, %v2094_v8  ;;  %v2106_v37 = vadd.f32 %v1408_v62, %v2037_v7 }
  0xf3   :  { %v554_v2 = vpop.f32.mrb[9].mxu1  ;;  %v1462_v3 = vpop.eup %1461  ;;  %v866_v4 = vadd.f32 1.0, %v1460_v63  ;;  %1481 = vpow2.f32 %v809_v59  ;;  %v751_v36 = vmul.f32 1.442695, %v680_v13  ;;  %v815_v43 = vmul.f32 1.442695, %v712_v20 }
  0xf4   :  { %v1464_v5 = vpop.eup %1463  ;;  %v898_v6 = vadd.f32 1.0, %v1462_v3  ;;  %v711_v44 = vsub.f32 0.0, %v2099_v21  ;;  %v682_v52 = vsub.f32 0.0, %v2102_v27  ;;  %v2117_v53 = vadd.f32 %v2037_v7, %v394_v1 }
  0xf5   :  { %v1466_v9 = vpop.eup %1465  ;;  %1483 = vrcp.f32 %v866_v4  ;;  %v865_v12 = vadd.f32 1.0, %v1464_v5  ;;  %v1363_v16 = vpop.f32.mrb[10].mxu0  ;;  %v749_v56 = vmul.f32 1.442695, %v679_v33  ;;  %v2120_v57 = vadd.f32 %v2037_v7, %v554_v2 }
  0xf6   :  { %v1411_v17 = vpop.f32.mrb[10].mxu1  ;;  %v1468_v18 = vpop.eup %1467  ;;  %1485 = vrcp.f32 %v898_v6  ;;  %v897_v19 = vadd.f32 1.0, %v1466_v9  ;;  %v714_v61 = vsub.f32 0.0, %v2106_v37  ;;  %v2124_v62 = vadd.f32 %v1363_v16, %v2037_v7 }
  0xf7   :  { %v404_v22 = vpop.f32.mrb[11].mxu0  ;;  %v1470_v23 = vpop.eup %1469  ;;  %1487 = vrcp.f32 %v865_v12  ;;  %v868_v26 = vadd.f32 1.0, %v1468_v18  ;;  %v813_v4 = vmul.f32 1.442695, %v711_v44  ;;  %v2131_v5 = vadd.f32 %v1411_v17, %v2037_v7 }
  0xf8   :  { %v564_v28 = vpop.f32.mrb[11].mxu1  ;;  %v1472_v29 = vpop.eup %1471  ;;  %1489 = vrcp.f32 %v897_v19  ;;  %v900_v32 = vadd.f32 1.0, %v1470_v23  ;;  %v755_v12 = vmul.f32 1.442695, %v682_v52  ;;  %v681_v13 = vsub.f32 0.0, %v2117_v53 }
  0xf9   :  { %v1474_v34 = vpop.eup %1473  ;;  %1491 = vrcp.f32 %v868_v26  ;;  %v867_v35 = vadd.f32 1.0, %v1472_v29  ;;  %v1366_v38 = vpop.f32.mrb[12].mxu0  ;;  %v2139_v16 = vadd.f32 %v2037_v7, %v404_v22  ;;  %v713_v20 = vsub.f32 0.0, %v2120_v57 }
  0xfa   :  { %v2108_v39 = vpop.f32.mrb[12].mxu1  ;;  %v1476_v41 = vpop.eup %1475  ;;  %1493 = vrcp.f32 %v900_v32  ;;  %v899_v42 = vadd.f32 1.0, %v1474_v34  ;;  %v2144_v17 = vadd.f32 %v2037_v7, %v564_v28  ;;  %v684_v29 = vsub.f32 0.0, %v2124_v62 }
  0xfb   :  { %v2111_v46 = vpop.f32.mrb[13].mxu0  ;;  %v2113_v49 = vpop.f32.mrb[13].mxu1  ;;  %1495 = vrcp.f32 %v867_v35  ;;  %v870_v51 = vadd.f32 1.0, %v1476_v41  ;;  %v2149_v32 = vadd.f32 %v1366_v38, %v2037_v7  ;;  %v819_v28 = vmul.f32 1.442695, %v714_v61 }
  0xfc   :  { %v1478_v50 = vpop.eup %1477  ;;  %1497 = vrcp.f32 %v899_v42  ;;  %v716_v35 = vsub.f32 0.0, %v2131_v5  ;;  %v753_v42 = vmul.f32 1.442695, %v681_v13  ;;  %v683_v44 = vsub.f32 0.0, %v2139_v16 }
  0xfd   :  { %v1480_v54 = vpop.eup %1479  ;;  %v902_v55 = vadd.f32 1.0, %v1478_v50  ;;  %1499 = vrcp.f32 %v870_v51  ;;  %v2126_v63 = vpop.f32.mrb[14].mxu0  ;;  %v715_v51 = vsub.f32 0.0, %v2144_v17 }
  0xfe   :  { %v1482_v58 = vpop.eup %1481  ;;  %v869_v59 = vadd.f32 1.0, %v1480_v54  ;;  %v2128_v3 = vpop.f32.mrb[14].mxu1  ;;  %v823_v61 = vmul.f32 1.442695, %v716_v35 }
  0xff   :  { %1501 = vrcp.f32 %v902_v55  ;;  %v901_v1 = vadd.f32 1.0, %v1482_v58  ;;  %v2133_v2 = vpop.f32.mrb[15].mxu0  ;;  %v2135_v6 = vpop.f32.mrb[15].mxu1  ;;  %v759_v55 = vmul.f32 1.442695, %v684_v29 }
 0x100   :  { %v1484_v9 = vpop.eup %1483  ;;  %1503 = vrcp.f32 %v869_v59 }
 0x101   :  { %v1486_v18 = vpop.eup %1485  ;;  %v1058_v19 = vmul.f32 %v1484_v9, %v2040_v10  ;;  %1505 = vrcp.f32 %v901_v1  ;;  %v2151_v22 = vpop.f32.mrb[16].mxu0 }
 0x102   :  { %v1488_v23 = vpop.eup %1487  ;;  %v1090_v26 = vmul.f32 %v1486_v18, %v2043_v11  ;;  %1507 = vpow2.f32 %v751_v36  ;;  %v2153_v33 = vpop.f32.mrb[16].mxu1 }
 0x103   :  { %v1490_v10 = vpop.eup %1489  ;;  %1122 = vst [vmem:[#allocation2 + $0x8] sm:$0xff] %v1058_v19  ;;  %v1057_v34 = vmul.f32 %v1488_v23, %v2046_v14  ;;  %1509 = vpow2.f32 %v815_v43  ;;  %v2157_v41 = vpop.f32.mrb[17].mxu0  ;;  %v817_v43 = vmul.f32 1.442695, %v713_v20  ;;  %v821_v19 = vmul.f32 1.442695, %v715_v51 }
 0x104   :  { %v2159_v11 = vpop.f32.mrb[17].mxu1  ;;  %v1492_v36 = vpop.eup %1491  ;;  %1154 = vst [vmem:[#allocation2 + $0x108] sm:$0xff] %v1090_v26  ;;  %v1089_v38 = vmul.f32 %v1490_v10, %v2049_v15  ;;  %1511 = vpow2.f32 %v749_v56  ;;  %v686_v15 = vsub.f32 0.0, %v2149_v32 }
 0x105   :  { %v1494_v50 = vpop.eup %1493  ;;  %1121 = vst [vmem:[#allocation2] sm:$0xff] %v1057_v34  ;;  %v1060_v14 = vmul.f32 %v1492_v36, %v2056_v24  ;;  %1513 = vpow2.f32 %v813_v4  ;;  %v2167_v56 = vpop.f32.mrb[18].mxu0 }
 0x106   :  { %v1496_v52 = vpop.eup %1495  ;;  %1153 = vst [vmem:[#allocation2 + $0x100] sm:$0xff] %v1089_v38  ;;  %v1092_v54 = vmul.f32 %v1494_v50, %v2059_v25  ;;  %1515 = vpow2.f32 %v755_v12  ;;  %v2169_v58 = vpop.f32.mrb[18].mxu1  ;;  %v757_v12 = vmul.f32 1.442695, %v683_v44  ;;  %v763_v23 = vmul.f32 1.442695, %v686_v15 }
 0x107   :  { %v1498_v59 = vpop.eup %1497  ;;  %1124 = vst [vmem:[#allocation2 + $0x18] sm:$0xff] %v1060_v14  ;;  %v1059_v24 = vmul.f32 %v1496_v52, %v2062_v30  ;;  %1517 = vpow2.f32 %v819_v28  ;;  %v2172_v1 = vpop.f32.mrb[19].mxu0 }
 0x108   :  { %v2174_v4 = vpop.f32.mrb[19].mxu1  ;;  %v1500_v9 = vpop.eup %1499  ;;  %1156 = vst [vmem:[#allocation2 + $0x118] sm:$0xff] %v1092_v54  ;;  %v1091_v25 = vmul.f32 %v1498_v59, %v2065_v31  ;;  %1519 = vpow2.f32 %v753_v42 }
 0x109   :  { %v1502_v13 = vpop.eup %1501  ;;  %1123 = vst [vmem:[#allocation2 + $0x10] sm:$0xff] %v1059_v24  ;;  %v1062_v18 = vmul.f32 %v1500_v9, %v2072_v40  ;;  %1521 = vpow2.f32 %v817_v43  ;;  %v2179_v26 = vpop.f32.mrb[20].mxu0  ;;  %v2203_v43 = vadd.f32 %v2037_v7, %v2113_v49  ;;  %v2217_v49 = vadd.f32 %v2128_v3, %v2037_v7 }
 0x10a   :  { %v1504_v20 = vpop.eup %1503  ;;  %1155 = vst [vmem:[#allocation2 + $0x110] sm:$0xff] %v1091_v25  ;;  %v1094_v30 = vmul.f32 %v1502_v13, %v2075_v45  ;;  %1523 = vpow2.f32 %v759_v55  ;;  %v2181_v29 = vpop.f32.mrb[20].mxu1  ;;  %v2191_v45 = vadd.f32 %v2108_v39, %v2037_v7  ;;  %v2210_v55 = vadd.f32 %v2126_v63, %v2037_v7 }
 0x10b   :  { %v1506_v10 = vpop.eup %1505  ;;  %1126 = vst [vmem:[#allocation2 + $0x28] sm:$0xff] %v1062_v18  ;;  %v1061_v31 = vmul.f32 %v1504_v20, %v2079_v47  ;;  %1525 = vpow2.f32 %v823_v61  ;;  %v2184_v34 = vpop.f32.mrb[21].mxu0  ;;  %v2195_v47 = vadd.f32 %v2037_v7, %v2111_v46  ;;  %v717_v20 = vsub.f32 0.0, %v2203_v43 }
 0x10c   :  { %v2186_v40 = vpop.f32.mrb[21].mxu1  ;;  %v1508_v28 = vpop.eup %1507  ;;  %1158 = vst [vmem:[#allocation2 + $0x128] sm:$0xff] %v1094_v30  ;;  %v1093_v35 = vmul.f32 %v1506_v10, %v2082_v48  ;;  %1527 = vpow2.f32 %v757_v12  ;;  %v718_v54 = vsub.f32 0.0, %v2191_v45  ;;  %v2221_v12 = vadd.f32 %v2037_v7, %v2133_v2 }
 0x10d   :  { %v1510_v36 = vpop.eup %1509  ;;  %1125 = vst [vmem:[#allocation2 + $0x20] sm:$0xff] %v1061_v31  ;;  %v872_v38 = vadd.f32 1.0, %v1508_v28  ;;  %1529 = vpow2.f32 %v821_v19  ;;  %v2197_v50 = vpop.f32.mrb[22].mxu0  ;;  %v685_v61 = vsub.f32 0.0, %v2195_v47  ;;  %v688_v2 = vsub.f32 0.0, %v2210_v55 }
 0x10e   :  { %v1512_v42 = vpop.eup %1511  ;;  %1157 = vst [vmem:[#allocation2 + $0x120] sm:$0xff] %v1093_v35  ;;  %v904_v44 = vadd.f32 1.0, %v1510_v36  ;;  %1531 = vpow2.f32 %v763_v23  ;;  %v2199_v48 = vpop.f32.mrb[22].mxu1  ;;  %v827_v31 = vmul.f32 1.442695, %v718_v54 }
 0x10f   :  { %v1514_v14 = vpop.eup %1513  ;;  %1533 = vrcp.f32 %v872_v38  ;;  %v871_v39 = vadd.f32 1.0, %v1512_v42  ;;  %v2205_v51 = vpop.f32.mrb[23].mxu0  ;;  %v761_v36 = vmul.f32 1.442695, %v685_v61  ;;  %v720_v38 = vsub.f32 0.0, %v2217_v49 }
 0x110   :  { %v1516_v52 = vpop.eup %1515  ;;  %1535 = vrcp.f32 %v904_v44  ;;  %v903_v46 = vadd.f32 1.0, %v1514_v14  ;;  %v2212_v15 = vpop.f32.mrb[23].mxu1  ;;  %v687_v14 = vsub.f32 0.0, %v2221_v12 }
 0x111   :  { %v1518_v59 = vpop.eup %1517  ;;  %1537 = vrcp.f32 %v871_v39  ;;  %v874_v24 = vadd.f32 1.0, %v1516_v52  ;;  %v2223_v63 = vpop.f32.mrb[24].mxu0  ;;  %v2237_v39 = vadd.f32 %v2037_v7, %v2135_v6  ;;  %v2251_v6 = vadd.f32 %v2153_v33, %v2037_v7 }
 0x112   :  { %v1520_v9 = vpop.eup %1519  ;;  %1539 = vrcp.f32 %v903_v46  ;;  %v906_v25 = vadd.f32 1.0, %v1518_v59  ;;  %v2225_v13 = vpop.f32.mrb[24].mxu1  ;;  %v825_v59 = vmul.f32 1.442695, %v717_v20  ;;  %v2263_v33 = vadd.f32 %v2037_v7, %v2159_v11 }
 0x113   :  { %v1522_v18 = vpop.eup %1521  ;;  %1541 = vrcp.f32 %v874_v24  ;;  %v873_v19 = vadd.f32 1.0, %v1520_v9  ;;  %v2228_v30 = vpop.f32.mrb[25].mxu0  ;;  %v2243_v24 = vadd.f32 %v2151_v22, %v2037_v7  ;;  %v2257_v22 = vadd.f32 %v2037_v7, %v2157_v41 }
 0x114   :  { %v2230_v3 = vpop.f32.mrb[25].mxu1  ;;  %v1524_v23 = vpop.eup %1523  ;;  %1543 = vrcp.f32 %v906_v25  ;;  %v905_v10 = vadd.f32 1.0, %v1522_v18 }
 0x115   :  { %v1526_v28 = vpop.eup %1525  ;;  %1545 = vrcp.f32 %v873_v19  ;;  %v876_v35 = vadd.f32 1.0, %v1524_v23  ;;  %v2239_v52 = vpop.f32.mrb[26].mxu0  ;;  %v767_v19 = vmul.f32 1.442695, %v688_v2  ;;  %v719_v2 = vsub.f32 0.0, %v2237_v39 }
 0x116   :  { %v1528_v42 = vpop.eup %1527  ;;  %1547 = vrcp.f32 %v905_v10  ;;  %v908_v44 = vadd.f32 1.0, %v1526_v28  ;;  %v2245_v61 = vpop.f32.mrb[26].mxu1  ;;  %v831_v28 = vmul.f32 1.442695, %v720_v38  ;;  %v690_v41 = vsub.f32 0.0, %v2243_v24 }
 0x117   :  { %v1530_v46 = vpop.eup %1529  ;;  %1549 = vrcp.f32 %v876_v35  ;;  %v875_v54 = vadd.f32 1.0, %v1528_v42  ;;  %v2247_v9 = vpop.f32.mrb[27].mxu0 }
 0x118   :  { %v1532_v25 = vpop.eup %1531  ;;  %1551 = vrcp.f32 %v908_v44  ;;  %v907_v18 = vadd.f32 1.0, %v1530_v46  ;;  %v2253_v23 = vpop.f32.mrb[27].mxu1 }
 0x119   :  { %v1534_v10 = vpop.eup %1533  ;;  %1553 = vrcp.f32 %v875_v54  ;;  %v878_v20 = vadd.f32 1.0, %v1532_v25  ;;  %v2265_v44 = vpop.f32.mrb[28].mxu0 }
 0x11a   :  { %v1536_v35 = vpop.eup %1535  ;;  %v1064_v42 = vmul.f32 %v1534_v10, %v2088_v60  ;;  %1555 = vrcp.f32 %v907_v18  ;;  %2486 = vst [vmem:[#allocation5_spill] sm:$0xff] %v2265_v44  ;;  %v2267_v46 = vpop.f32.mrb[28].mxu1  ;;  %v2273_v60 = vadd.f32 %v2167_v56, %v2037_v7 }
 0x11b   :  { %2487 = vst [vmem:[#allocation6_spill] sm:$0xff] %v2267_v46  ;;  %v1538_v54 = vpop.eup %1537  ;;  %v1096_v38 = vmul.f32 %v1536_v35, %v2091_v0  ;;  %1557 = vrcp.f32 %v878_v20  ;;  %v2275_v25 = vpop.f32.mrb[29].mxu0  ;;  %v722_v46 = vsub.f32 0.0, %v2251_v6  ;;  %v2283_v0 = vadd.f32 %v2169_v58, %v2037_v7 }
 0x11c   :  { %2488 = vst [vmem:[#allocation7_spill] sm:$0xff] %v2275_v25  ;;  %v2277_v18 = vpop.f32.mrb[29].mxu1  ;;  %v1540_v11 = vpop.eup %1539  ;;  %1128 = vst [vmem:[#allocation2 + $0x38] sm:$0xff] %v1064_v42  ;;  %v1063_v10 = vmul.f32 %v1538_v54, %v2094_v8  ;;  %1559 = vpow2.f32 %v827_v31  ;;  %v765_v35 = vmul.f32 1.442695, %v687_v14  ;;  %v689_v25 = vsub.f32 0.0, %v2257_v22 }
 0x11d   :  { %2489 = vst [vmem:[#allocation8_spill] sm:$0xff] %v2277_v18  ;;  %v1542_v20 = vpop.eup %1541  ;;  %1160 = vst [vmem:[#allocation2 + $0x138] sm:$0xff] %v1096_v38  ;;  %v1095_v56 = vmul.f32 %v1540_v11, %v2099_v21  ;;  %1561 = vpow2.f32 %v761_v36  ;;  %v829_v8 = vmul.f32 1.442695, %v719_v2  ;;  %v721_v31 = vsub.f32 0.0, %v2263_v33  ;;  %v2289_v54 = vpop.f32.mrb[30].mxu0 }
 0x11e   :  { %v1544_v18 = vpop.eup %1543  ;;  %1127 = vst [vmem:[#allocation2 + $0x30] sm:$0xff] %v1063_v10  ;;  %v1066_v42 = vmul.f32 %v1542_v20, %v2102_v27  ;;  %1563 = vpow2.f32 %v825_v59  ;;  %v2291_v58 = vpop.f32.mrb[30].mxu1  ;;  %v771_v36 = vmul.f32 1.442695, %v690_v41  ;;  %v692_v14 = vsub.f32 0.0, %v2273_v60 }
 0x11f   :  { %v1546_v44 = vpop.eup %1545  ;;  %1159 = vst [vmem:[#allocation2 + $0x130] sm:$0xff] %v1095_v56  ;;  %v1098_v21 = vmul.f32 %v1544_v18, %v2106_v37  ;;  %1565 = vpow2.f32 %v767_v19  ;;  %v2295_v38 = vpop.f32.mrb[31].mxu0  ;;  %v835_v2 = vmul.f32 1.442695, %v722_v46  ;;  %v724_v10 = vsub.f32 0.0, %v2283_v0 }
 0x120   :  { %v2297_v11 = vpop.f32.mrb[31].mxu1  ;;  %v1548_v27 = vpop.eup %1547  ;;  %1130 = vst [vmem:[#allocation2 + $0x48] sm:$0xff] %v1066_v42  ;;  %v1065_v59 = vmul.f32 %v1546_v44, %v2117_v53  ;;  %1567 = vpow2.f32 %v831_v28  ;;  %v769_v19 = vmul.f32 1.442695, %v689_v25  ;;  %v833_v56 = vmul.f32 1.442695, %v721_v31 }
 0x121   :  { %2490 = vst [vmem:[#allocation9_spill] sm:$0xff] %v2297_v11  ;;  %v1550_v20 = vpop.eup %1549  ;;  %1162 = vst [vmem:[#allocation2 + $0x148] sm:$0xff] %v1098_v21  ;;  %v1097_v37 = vmul.f32 %v1548_v27, %v2120_v57  ;;  %1569 = vpow2.f32 %v765_v35  ;;  %v775_v28 = vmul.f32 1.442695, %v692_v14  ;;  %v839_v57 = vmul.f32 1.442695, %v724_v10 }
 0x122   :  { %v1552_v41 = vpop.eup %1551  ;;  %1129 = vst [vmem:[#allocation2 + $0x40] sm:$0xff] %v1065_v59  ;;  %v1068_v18 = vmul.f32 %v1550_v20, %v2124_v62  ;;  %1571 = vpow2.f32 %v829_v8  ;;  %v2321_v14 = vadd.f32 %v2181_v29, %v2037_v7  ;;  %v2326_v59 = vadd.f32 %v2037_v7, %v2184_v34 }
 0x123   :  { %v1554_v11 = vpop.eup %1553  ;;  %1161 = vst [vmem:[#allocation2 + $0x140] sm:$0xff] %v1097_v37  ;;  %v1100_v53 = vmul.f32 %v1552_v41, %v2131_v5  ;;  %1573 = vpow2.f32 %v771_v36  ;;  %v2309_v5 = vadd.f32 %v2037_v7, %v2172_v1 }
 0x124   :  { %v1556_v44 = vpop.eup %1555  ;;  %1132 = vst [vmem:[#allocation2 + $0x58] sm:$0xff] %v1068_v18  ;;  %v1067_v46 = vmul.f32 %v1554_v11, %v2139_v16  ;;  %1575 = vpow2.f32 %v835_v2  ;;  %v2313_v16 = vadd.f32 %v2037_v7, %v2174_v4  ;;  %v726_v18 = vsub.f32 0.0, %v2321_v14 }
 0x125   :  { %v1558_v35 = vpop.eup %1557  ;;  %1164 = vst [vmem:[#allocation2 + $0x158] sm:$0xff] %v1100_v53  ;;  %v1099_v25 = vmul.f32 %v1556_v44, %v2144_v17  ;;  %1577 = vpow2.f32 %v769_v19  ;;  %v691_v4 = vsub.f32 0.0, %v2309_v5 }
 0x126   :  { %v1560_v62 = vpop.eup %1559  ;;  %1131 = vst [vmem:[#allocation2 + $0x50] sm:$0xff] %v1067_v46  ;;  %v1070_v42 = vmul.f32 %v1558_v35, %v2149_v32  ;;  %1579 = vpow2.f32 %v833_v56  ;;  %v2317_v32 = vadd.f32 %v2179_v26, %v2037_v7  ;;  %v723_v10 = vsub.f32 0.0, %v2313_v16 }
 0x127   :  { %v1562_v8 = vpop.eup %1561  ;;  %1163 = vst [vmem:[#allocation2 + $0x150] sm:$0xff] %v1099_v25  ;;  %v910_v31 = vadd.f32 1.0, %v1560_v62  ;;  %1581 = vpow2.f32 %v775_v28  ;;  %v773_v34 = vmul.f32 1.442695, %v691_v4  ;;  %v693_v28 = vsub.f32 0.0, %v2326_v59 }
 0x128   :  { %v1564_v21 = vpop.eup %1563  ;;  %1134 = vst [vmem:[#allocation2 + $0x68] sm:$0xff] %v1070_v42  ;;  %v877_v17 = vadd.f32 1.0, %v1562_v8  ;;  %1583 = vpow2.f32 %v839_v57  ;;  %v694_v29 = vsub.f32 0.0, %v2317_v32  ;;  %v837_v57 = vmul.f32 1.442695, %v723_v10 }
 0x129   :  { %v1566_v36 = vpop.eup %1565  ;;  %1585 = vrcp.f32 %v910_v31  ;;  %v909_v1 = vadd.f32 1.0, %v1564_v21  ;;  %v2334_v35 = vadd.f32 %v2037_v7, %v2186_v40  ;;  %v2338_v8 = vadd.f32 %v2197_v50, %v2037_v7 }
 0x12a   :  { %v1568_v11 = vpop.eup %1567  ;;  %1587 = vrcp.f32 %v877_v17  ;;  %v880_v27 = vadd.f32 1.0, %v1566_v36  ;;  %v779_v42 = vmul.f32 1.442695, %v694_v29  ;;  %v843_v17 = vmul.f32 1.442695, %v726_v18 }
 0x12b   :  { %v1570_v2 = vpop.eup %1569  ;;  %1589 = vrcp.f32 %v909_v1  ;;  %v912_v26 = vadd.f32 1.0, %v1568_v11  ;;  %v2342_v36 = vadd.f32 %v2199_v48, %v2037_v7  ;;  %v777_v11 = vmul.f32 1.442695, %v693_v28 }
 0x12c   :  { %v1572_v20 = vpop.eup %1571  ;;  %1591 = vrcp.f32 %v880_v27  ;;  %v879_v37 = vadd.f32 1.0, %v1570_v2  ;;  %v2346_v27 = vadd.f32 %v2037_v7, %v2205_v51  ;;  %v725_v2 = vsub.f32 0.0, %v2334_v35 }
 0x12d   :  { %v1574_v19 = vpop.eup %1573  ;;  %1593 = vrcp.f32 %v912_v26  ;;  %v911_v41 = vadd.f32 1.0, %v1572_v20  ;;  %v2351_v26 = vadd.f32 %v2037_v7, %v2212_v15  ;;  %v696_v20 = vsub.f32 0.0, %v2338_v8 }
 0x12e   :  { %v1576_v56 = vpop.eup %1575  ;;  %1595 = vrcp.f32 %v879_v37  ;;  %v882_v53 = vadd.f32 1.0, %v1574_v19  ;;  %v2357_v37 = vadd.f32 %v2223_v63, %v2037_v7  ;;  %v728_v19 = vsub.f32 0.0, %v2342_v36 }
 0x12f   :  { %v1578_v44 = vpop.eup %1577  ;;  %1597 = vrcp.f32 %v911_v41  ;;  %v914_v46 = vadd.f32 1.0, %v1576_v56  ;;  %v2363_v15 = vadd.f32 %v2225_v13, %v2037_v7  ;;  %v695_v18 = vsub.f32 0.0, %v2346_v27 }
 0x130   :  { %v1580_v25 = vpop.eup %1579  ;;  %1599 = vrcp.f32 %v882_v53  ;;  %v881_v62 = vadd.f32 1.0, %v1578_v44  ;;  %v2369_v63 = vadd.f32 %v2037_v7, %v2228_v30  ;;  %v841_v53 = vmul.f32 1.442695, %v725_v2 }
 0x131   :  { %v1582_v31 = vpop.eup %1581  ;;  %1601 = vrcp.f32 %v914_v46  ;;  %v913_v21 = vadd.f32 1.0, %v1580_v25  ;;  %v727_v13 = vsub.f32 0.0, %v2351_v26  ;;  %v847_v25 = vmul.f32 1.442695, %v728_v19 }
 0x132   :  { %v1584_v1 = vpop.eup %1583  ;;  %1603 = vrcp.f32 %v881_v62  ;;  %v884_v40 = vadd.f32 1.0, %v1582_v31  ;;  %v781_v31 = vmul.f32 1.442695, %v695_v18 }
 0x133   :  { %v1586_v4 = vpop.eup %1585  ;;  %1605 = vrcp.f32 %v913_v21  ;;  %v916_v50 = vadd.f32 1.0, %v1584_v1  ;;  %v845_v1 = vmul.f32 1.442695, %v727_v13 }
 0x134   :  { %v1588_v10 = vpop.eup %1587  ;;  %v1102_v48 = vmul.f32 %v1586_v4, %v2191_v45  ;;  %1607 = vrcp.f32 %v884_v40 }
 0x135   :  { %v1590_v51 = vpop.eup %1589  ;;  %v1069_v29 = vmul.f32 %v1588_v10, %v2195_v47  ;;  %1609 = vrcp.f32 %v916_v50 }
 0x136   :  { %v1592_v41 = vpop.eup %1591  ;;  %1166 = vst [vmem:[#allocation2 + $0x168] sm:$0xff] %v1102_v48  ;;  %v1101_v45 = vmul.f32 %v1590_v51, %v2203_v43  ;;  %1611 = vpow2.f32 %v773_v34  ;;  %v783_v43 = vmul.f32 1.442695, %v696_v20  ;;  %v698_v34 = vsub.f32 0.0, %v2357_v37 }
 0x137   :  { %v1594_v56 = vpop.eup %1593  ;;  %1133 = vst [vmem:[#allocation2 + $0x60] sm:$0xff] %v1069_v29  ;;  %v1072_v47 = vmul.f32 %v1592_v41, %v2210_v55  ;;  %1613 = vpow2.f32 %v837_v57  ;;  %v730_v55 = vsub.f32 0.0, %v2363_v15 }
 0x138   :  { %v1596_v28 = vpop.eup %1595  ;;  %1165 = vst [vmem:[#allocation2 + $0x160] sm:$0xff] %v1101_v45  ;;  %v1104_v44 = vmul.f32 %v1594_v56, %v2217_v49  ;;  %1615 = vpow2.f32 %v779_v42  ;;  %v697_v49 = vsub.f32 0.0, %v2369_v63  ;;  %v2399_v45 = vadd.f32 %v2037_v7, %v2247_v9  ;;  %v1715_v9 = vld [vmem:[%s2484_s2] ss:$0 sm:$0xff]  ;;  %s1740_s2 = smov [#allocation2]  }
 0x139   :  { %v1598_v46 = vpop.eup %1597  ;;  %1136 = vst [vmem:[#allocation2 + $0x78] sm:$0xff] %v1072_v47  ;;  %v1071_v30 = vmul.f32 %v1596_v28, %v2221_v12  ;;  %1617 = vpow2.f32 %v843_v17  ;;  %v787_v17 = vmul.f32 1.442695, %v698_v34  ;;  %s1190_s13 = sshll.u32 %s1740_s2, 4  ;;  %s1191_s13 = int_to_ptr.vmem [resolvable:$true] %s1190_s13 }
 0x13a   :  { %v1600_v57 = vpop.eup %1599  ;;  %1168 = vst [vmem:[#allocation2 + $0x178] sm:$0xff] %v1104_v44  ;;  %v1103_v62 = vmul.f32 %v1598_v46, %v2237_v39  ;;  %1619 = vpow2.f32 %v777_v11  ;;  %v851_v11 = vmul.f32 1.442695, %v730_v55  ;;  %v2409_v46 = vadd.f32 %v1715_v9, %v2253_v23  ;;  %v2493_v23 = vld [vmem:[#allocation7_spill] sm:$0xff]  ;;  %s1716_s14 = scalar_lea.vmem %s1191_s13, 8192  ;;  %p1721_p1 = scmp.lt.s32.totalorder %s1191_s13, %s1191_s13 }
 0x13b   :  { %v1602_v42 = vpop.eup %1601  ;;  %1135 = vst [vmem:[#allocation2 + $0x70] sm:$0xff] %v1071_v30  ;;  %v1074_v21 = vmul.f32 %v1600_v57, %v2243_v24  ;;  %1621 = vpow2.f32 %v841_v53  ;;  %v785_v24 = vmul.f32 1.442695, %v697_v49  ;;  %v2491_v57 = vld [vmem:[#allocation5_spill] sm:$0xff]  ;;  %p1717_p0 = scmp.ne.s32.totalorder %s1191_s13, %s1716_s14  ;;  %p1722_p2 = scmp.lt.s32.totalorder %s1716_s14, %s1716_s14 }
 0x13c   :  { %v1604_v40 = vpop.eup %1603  ;;  %1167 = vst [vmem:[#allocation2 + $0x170] sm:$0xff] %v1103_v62  ;;  %v1106_v12 = vmul.f32 %v1602_v42, %v2251_v6  ;;  %1623 = vpow2.f32 %v783_v43  ;;  %v2412_v62 = vadd.f32 %v1715_v9, %v2491_v57 }
 0x13d   :  { %v1606_v4 = vpop.eup %1605  ;;  %1138 = vst [vmem:[#allocation2 + $0x88] sm:$0xff] %v1074_v21  ;;  %v1073_v39 = vmul.f32 %v1604_v40, %v2257_v22  ;;  %1625 = vpow2.f32 %v847_v25  ;;  %v2387_v22 = vadd.f32 %v2037_v7, %v2230_v3  ;;  %v2492_v21 = vld [vmem:[#allocation6_spill] sm:$0xff]  ;;  %p1723_p3 = por %p1722_p2, %p1721_p1 }
 0x13e   :  { %v1608_v50 = vpop.eup %1607  ;;  %1170 = vst [vmem:[#allocation2 + $0x188] sm:$0xff] %v1106_v12  ;;  %v1105_v2 = vmul.f32 %v1606_v4, %v2263_v33  ;;  %1627 = vpow2.f32 %v781_v31  ;;  %v2391_v33 = vadd.f32 %v2239_v52, %v2037_v7  ;;  %v2418_v4 = vadd.f32 %v1715_v9, %v2493_v23 }
 0x13f   :  { %v1610_v10 = vpop.eup %1609  ;;  %1137 = vst [vmem:[#allocation2 + $0x80] sm:$0xff] %v1073_v39  ;;  %v1076_v48 = vmul.f32 %v1608_v50, %v2273_v60  ;;  %1629 = vpow2.f32 %v845_v1  ;;  %v729_v52 = vsub.f32 0.0, %v2387_v22  ;;  %v2415_v1 = vadd.f32 %v1715_v9, %v2492_v21  ;;  %p1724_p4 = pnand %p1723_p3, %p1717_p0 }
 0x140   :  { %v1612_v6 = vpop.eup %1611  ;;  %1169 = vst [vmem:[#allocation2 + $0x180] sm:$0xff] %v1105_v2  ;;  %v1108_v20 = vmul.f32 %v1610_v10, %v2283_v0  ;;  %1631 = vpow2.f32 %v787_v17  ;;  %v2395_v0 = vadd.f32 %v2245_v61, %v2037_v7  ;;  %v700_v13 = vsub.f32 0.0, %v2391_v33 }
 0x141   :  { %v1614_v51 = vpop.eup %1613  ;;  %1140 = vst [vmem:[#allocation2 + $0x98] sm:$0xff] %v1076_v48  ;;  %v883_v29 = vadd.f32 1.0, %v1612_v6  ;;  %1633 = vpow2.f32 %v851_v11  ;;  %v699_v7 = vsub.f32 0.0, %v2399_v45  ;;  %v849_v55 = vmul.f32 1.442695, %v729_v52  ;;  %v2494_v6 = vld [vmem:[#allocation8_spill] sm:$0xff] }
 0x142   :  { %v1616_v19 = vpop.eup %1615  ;;  %1172 = vst [vmem:[#allocation2 + $0x198] sm:$0xff] %v1108_v20  ;;  %v915_v60 = vadd.f32 1.0, %v1614_v51  ;;  %1635 = vpow2.f32 %v785_v24  ;;  %v732_v44 = vsub.f32 0.0, %v2395_v0  ;;  %v791_v42 = vmul.f32 1.442695, %v700_v13 }
 0x143   :  { %v1618_v41 = vpop.eup %1617  ;;  %1637 = vrcp.f32 %v883_v29  ;;  %v886_v3 = vadd.f32 1.0, %v1616_v19  ;;  %v789_v50 = vmul.f32 1.442695, %v699_v7  ;;  %v731_v2 = vsub.f32 0.0, %v2409_v46 }
 0x144   :  { %v1620_v18 = vpop.eup %1619  ;;  %1639 = vrcp.f32 %v915_v60  ;;  %v918_v56 = vadd.f32 1.0, %v1618_v41  ;;  %v855_v17 = vmul.f32 1.442695, %v732_v44  ;;  %v702_v48 = vsub.f32 0.0, %v2412_v62 }
 0x145   :  { %v1622_v47 = vpop.eup %1621  ;;  %1641 = vrcp.f32 %v886_v3  ;;  %v885_v53 = vadd.f32 1.0, %v1620_v18  ;;  %v2423_v20 = vadd.f32 %v1715_v9, %v2494_v6  ;;  %v734_v19 = vsub.f32 0.0, %v2415_v1 }
 0x146   :  { %v1624_v28 = vpop.eup %1623  ;;  %1643 = vrcp.f32 %v918_v56  ;;  %v917_v61 = vadd.f32 1.0, %v1622_v47  ;;  %v2427_v60 = vadd.f32 %v1715_v9, %v2289_v54  ;;  %v701_v18 = vsub.f32 0.0, %v2418_v4 }
 0x147   :  { %v1626_v43 = vpop.eup %1625  ;;  %1645 = vrcp.f32 %v885_v53  ;;  %v888_v34 = vadd.f32 1.0, %v1624_v28  ;;  %v2432_v56 = vadd.f32 %v1715_v9, %v2291_v58  ;;  %v853_v53 = vmul.f32 1.442695, %v731_v2 }
 0x148   :  { %v1628_v30 = vpop.eup %1627  ;;  %1647 = vrcp.f32 %v917_v61  ;;  %v920_v25 = vadd.f32 1.0, %v1626_v43  ;;  %v2436_v13 = vadd.f32 %v1715_v9, %v2295_v38  ;;  %v2495_v61 = vld [vmem:[#allocation9_spill] sm:$0xff] }
 0x149   :  { %v1630_v31 = vpop.eup %1629  ;;  %1649 = vrcp.f32 %v888_v34  ;;  %v887_v49 = vadd.f32 1.0, %v1628_v30  ;;  %v2441_v44 = vadd.f32 %v1715_v9, %v2495_v61  ;;  %v704_v34 = vsub.f32 0.0, %v2427_v60 }
 0x14a   :  { %v1632_v40 = vpop.eup %1631  ;;  %1651 = vrcp.f32 %v920_v25  ;;  %v919_v12 = vadd.f32 1.0, %v1630_v31  ;;  %v736_v30 = vsub.f32 0.0, %v2432_v56 }
 0x14b   :  { %v1634_v39 = vpop.eup %1633  ;;  %1653 = vrcp.f32 %v887_v49  ;;  %v890_v11 = vadd.f32 1.0, %v1632_v40  ;;  %v799_v40 = vmul.f32 1.442695, %v704_v34 }
 0x14c   :  { %v1636_v24 = vpop.eup %1635  ;;  %1655 = vrcp.f32 %v919_v12  ;;  %v922_v10 = vadd.f32 1.0, %v1634_v39 }
 0x14d   :  { %v1638_v51 = vpop.eup %1637  ;;  %1657 = vrcp.f32 %v890_v11  ;;  %v889_v29 = vadd.f32 1.0, %v1636_v24 }
 0x14e   :  { %v1640_v41 = vpop.eup %1639  ;;  %v1075_v3 = vmul.f32 %v1638_v51, %v2309_v5  ;;  %1659 = vrcp.f32 %v922_v10  ;;  %v733_v5 = vsub.f32 0.0, %v2423_v20 }
 0x14f   :  { %v1642_v52 = vpop.eup %1641  ;;  %v1107_v47 = vmul.f32 %v1640_v41, %v2313_v16  ;;  %1661 = vrcp.f32 %v889_v29  ;;  %v795_v16 = vmul.f32 1.442695, %v702_v48 }
 0x150   :  { %v1644_v28 = vpop.eup %1643  ;;  %1139 = vst [vmem:[#allocation2 + $0x90] sm:$0xff] %v1075_v3  ;;  %v1078_v54 = vmul.f32 %v1642_v52, %v2317_v32  ;;  %1663 = vpow2.f32 %v849_v55  ;;  %v859_v32 = vmul.f32 1.442695, %v734_v19  ;;  %v793_v55 = vmul.f32 1.442695, %v701_v18 }
 0x151   :  { %v1646_v58 = vpop.eup %1645  ;;  %1171 = vst [vmem:[#allocation2 + $0x190] sm:$0xff] %v1107_v47  ;;  %v1110_v43 = vmul.f32 %v1644_v28, %v2321_v14  ;;  %1665 = vpow2.f32 %v791_v42  ;;  %v703_v14 = vsub.f32 0.0, %v2436_v13  ;;  %v857_v49 = vmul.f32 1.442695, %v733_v5 }
 0x152   :  { %v1648_v38 = vpop.eup %1647  ;;  %1142 = vst [vmem:[#allocation2 + $0xa8] sm:$0xff] %v1078_v54  ;;  %v1077_v7 = vmul.f32 %v1646_v58, %v2326_v59  ;;  %1667 = vpow2.f32 %v855_v17  ;;  %v735_v59 = vsub.f32 0.0, %v2441_v44  ;;  %v863_v17 = vmul.f32 1.442695, %v736_v30 }
 0x153   :  { %v1650_v25 = vpop.eup %1649  ;;  %1174 = vst [vmem:[#allocation2 + $0x1a8] sm:$0xff] %v1110_v43  ;;  %v1109_v9 = vmul.f32 %v1648_v38, %v2334_v35  ;;  %1669 = vpow2.f32 %v789_v50  ;;  %v797_v39 = vmul.f32 1.442695, %v703_v14 }
 0x154   :  { %v1652_v57 = vpop.eup %1651  ;;  %1141 = vst [vmem:[#allocation2 + $0xa0] sm:$0xff] %v1077_v7  ;;  %v1080_v31 = vmul.f32 %v1650_v25, %v2338_v8  ;;  %1671 = vpow2.f32 %v853_v53 }
 0x155   :  { %v1654_v42 = vpop.eup %1653  ;;  %1173 = vst [vmem:[#allocation2 + $0x1a0] sm:$0xff] %v1109_v9  ;;  %v1112_v21 = vmul.f32 %v1652_v57, %v2342_v36  ;;  %1673 = vpow2.f32 %v795_v16  ;;  %v861_v36 = vmul.f32 1.442695, %v735_v59 }
 0x156   :  { %v1656_v12 = vpop.eup %1655  ;;  %1144 = vst [vmem:[#allocation2 + $0xb8] sm:$0xff] %v1080_v31  ;;  %v1079_v35 = vmul.f32 %v1654_v42, %v2346_v27  ;;  %1675 = vpow2.f32 %v859_v32 }
 0x157   :  { %v1658_v23 = vpop.eup %1657  ;;  %1176 = vst [vmem:[#allocation2 + $0x1b8] sm:$0xff] %v1112_v21  ;;  %v1111_v8 = vmul.f32 %v1656_v12, %v2351_v26  ;;  %1677 = vpow2.f32 %v793_v55 }
 0x158   :  { %v1660_v11 = vpop.eup %1659  ;;  %1143 = vst [vmem:[#allocation2 + $0xb0] sm:$0xff] %v1079_v35  ;;  %v1082_v50 = vmul.f32 %v1658_v23, %v2357_v37  ;;  %1679 = vpow2.f32 %v857_v49 }
 0x159   :  { %v1662_v2 = vpop.eup %1661  ;;  %1175 = vst [vmem:[#allocation2 + $0x1b0] sm:$0xff] %v1111_v8  ;;  %v1114_v24 = vmul.f32 %v1660_v11, %v2363_v15  ;;  %1681 = vpow2.f32 %v799_v40 }
 0x15a   :  { %v1664_v27 = vpop.eup %1663  ;;  %1146 = vst [vmem:[#allocation2 + $0xc8] sm:$0xff] %v1082_v50  ;;  %v1081_v10 = vmul.f32 %v1662_v2, %v2369_v63  ;;  %1683 = vpow2.f32 %v863_v17 }
 0x15b   :  { %v1666_v48 = vpop.eup %1665  ;;  %1178 = vst [vmem:[#allocation2 + $0x1c8] sm:$0xff] %v1114_v24  ;;  %v921_v26 = vadd.f32 1.0, %v1664_v27  ;;  %1685 = vpow2.f32 %v797_v39 }
 0x15c   :  { %v1668_v6 = vpop.eup %1667  ;;  %1145 = vst [vmem:[#allocation2 + $0xc0] sm:$0xff] %v1081_v10  ;;  %v892_v51 = vadd.f32 1.0, %v1666_v48  ;;  %1687 = vpow2.f32 %v861_v36 }
 0x15d   :  { %v1670_v37 = vpop.eup %1669  ;;  %1689 = vrcp.f32 %v921_v26  ;;  %v924_v29 = vadd.f32 1.0, %v1668_v6 }
 0x15e   :  { %v1672_v19 = vpop.eup %1671  ;;  %1691 = vrcp.f32 %v892_v51  ;;  %v891_v15 = vadd.f32 1.0, %v1670_v37 }
 0x15f   :  { %v1674_v41 = vpop.eup %1673  ;;  %1693 = vrcp.f32 %v924_v29  ;;  %v923_v3 = vadd.f32 1.0, %v1672_v19 }
 0x160   :  { %v1676_v18 = vpop.eup %1675  ;;  %1695 = vrcp.f32 %v891_v15  ;;  %v894_v63 = vadd.f32 1.0, %v1674_v41 }
 0x161   :  { %v1678_v52 = vpop.eup %1677  ;;  %1697 = vrcp.f32 %v923_v3  ;;  %v926_v47 = vadd.f32 1.0, %v1676_v18 }
 0x162   :  { %v1680_v53 = vpop.eup %1679  ;;  %1699 = vrcp.f32 %v894_v63  ;;  %v893_v28 = vadd.f32 1.0, %v1678_v52 }
 0x163   :  { %v1682_v54 = vpop.eup %1681  ;;  %1701 = vrcp.f32 %v926_v47  ;;  %v925_v5 = vadd.f32 1.0, %v1680_v53 }
 0x164   :  { %v1684_v61 = vpop.eup %1683  ;;  %1703 = vrcp.f32 %v893_v28  ;;  %v896_v58 = vadd.f32 1.0, %v1682_v54 }
 0x165   :  { %v1686_v43 = vpop.eup %1685  ;;  %1705 = vrcp.f32 %v925_v5  ;;  %v928_v16 = vadd.f32 1.0, %v1684_v61 }
 0x166   :  { %v1688_v34 = vpop.eup %1687  ;;  %1707 = vrcp.f32 %v896_v58  ;;  %v895_v38 = vadd.f32 1.0, %v1686_v43 }
 0x167   :  { %v1690_v7 = vpop.eup %1689  ;;  %1709 = vrcp.f32 %v928_v16  ;;  %v927_v32 = vadd.f32 1.0, %v1688_v34 }
 0x168   :  { %v1692_v30 = vpop.eup %1691  ;;  %v1113_v25 = vmul.f32 %v1690_v7, %v2387_v22  ;;  %1711 = vrcp.f32 %v895_v38 }
 0x169   :  { %v1694_v9 = vpop.eup %1693  ;;  %v1084_v55 = vmul.f32 %v1692_v30, %v2391_v33  ;;  %1713 = vrcp.f32 %v927_v32 }
 0x16a   :  { %v1696_v14 = vpop.eup %1695  ;;  %1177 = vst [vmem:[#allocation2 + $0x1c0] sm:$0xff] %v1113_v25  ;;  %v1116_v57 = vmul.f32 %v1694_v9, %v2395_v0 }
 0x16b   :  { %v1698_v31 = vpop.eup %1697  ;;  %1148 = vst [vmem:[#allocation2 + $0xd8] sm:$0xff] %v1084_v55  ;;  %v1083_v49 = vmul.f32 %v1696_v14, %v2399_v45 }
 0x16c   :  { %v1700_v59 = vpop.eup %1699  ;;  %1180 = vst [vmem:[#allocation2 + $0x1d8] sm:$0xff] %v1116_v57  ;;  %v1115_v42 = vmul.f32 %v1698_v31, %v2409_v46 }
 0x16d   :  { %v1702_v21 = vpop.eup %1701  ;;  %1147 = vst [vmem:[#allocation2 + $0xd0] sm:$0xff] %v1083_v49  ;;  %v1086_v22 = vmul.f32 %v1700_v59, %v2412_v62 }
 0x16e   :  { %v1704_v40 = vpop.eup %1703  ;;  %1179 = vst [vmem:[#allocation2 + $0x1d0] sm:$0xff] %v1115_v42  ;;  %v1118_v33 = vmul.f32 %v1702_v21, %v2415_v1 }
 0x16f   :  { %v1706_v12 = vpop.eup %1705  ;;  %1150 = vst [vmem:[#allocation2 + $0xe8] sm:$0xff] %v1086_v22  ;;  %v1085_v0 = vmul.f32 %v1704_v40, %v2418_v4 }
 0x170   :  { %v1708_v35 = vpop.eup %1707  ;;  %1182 = vst [vmem:[#allocation2 + $0x1e8] sm:$0xff] %v1118_v33  ;;  %v1117_v45 = vmul.f32 %v1706_v12, %v2423_v20 }
 0x171   :  { %v1710_v17 = vpop.eup %1709  ;;  %1149 = vst [vmem:[#allocation2 + $0xe0] sm:$0xff] %v1085_v0  ;;  %v1088_v46 = vmul.f32 %v1708_v35, %v2427_v60 }
 0x172   :  { %v1712_v23 = vpop.eup %1711  ;;  %1181 = vst [vmem:[#allocation2 + $0x1e0] sm:$0xff] %v1117_v45  ;;  %v1120_v62 = vmul.f32 %v1710_v17, %v2432_v56 }
 0x173   :  { %v1714_v8 = vpop.eup %1713  ;;  %1152 = vst [vmem:[#allocation2 + $0xf8] sm:$0xff] %v1088_v46  ;;  %v1087_v1 = vmul.f32 %v1712_v23, %v2436_v13 }
 0x174   :  { %1184 = vst [vmem:[#allocation2 + $0x1f8] sm:$0xff] %v1120_v62  ;;  %v1119_v4 = vmul.f32 %v1714_v8, %v2441_v44 }
 0x175   :  { %1151 = vst [vmem:[#allocation2 + $0xf0] sm:$0xff] %v1087_v1 }
 0x176   :  { %1183 = vst [vmem:[#allocation2 + $0x1f0] sm:$0xff] %v1119_v4 }
 0x177   :  { %1727 = shalt.err (!%p1724_p4)
}
 0x178   :  { %s1728_s17 = scalar_lea.hbm %s2485_s3, 8192 }
 0x179   :  { %p1729_p5 = scmp.ne.s32.totalorder %s2485_s3, %s1728_s17  ;;  %p1732_p6 = scmp.lt.u32.totalorder %s1728_s17, %s2485_s3 }
 0x17b   :  { %p1734_p7 = pnand %p1732_p6, %p1729_p5 }
 0x17d   :  { %1737 = shalt.err (!%p1734_p7)
}
 0x17e   :  { %s1741_s22 = smov 128   ;;  %s1742_s23 = smov 8  }
 0x17f   :  { %1196 = dma.vmem_to_hbm [thread:$0]  %s1191_s13, 8192, %s2485_s3, [#allocation3], %s1741_s22, %s1741_s22, %s1742_s23  }
 0x180   :  { %1738 = dma.done.wait [#allocation3], 8192  }
 0x181   :  { %1739 = vsyncadd [#allocation3], 4294959104 }
 0x182   :  { %1200 = vsyncpa [#allocation3], 1 }

</bundles_post_ra>
